<compile_context>
chip_gen: v7x
topology: tpu7x:2x2x1
jax: 0.10.0
libtpu: 0.0.40
codegen_flags: <defaults>
</compile_context>

<pallas_src>
import functools

import jax
import jax.numpy as jnp
from jax import lax
from jax.experimental import pallas as pl
from jax.experimental.pallas import tpu as pltpu

EPS = 1e-5     # nn.InstanceNorm2d default eps
ALPHA = 0.2    # nn.LeakyReLU default in the module


def _round_up(v, m):
    return (v + m - 1) // m * m


def _conv_in_lrelu_kernel(xs_ref, w_ref, o_ref, *, l_valid, row_stride, n_valid, alpha):
    # xs_ref: (B, 4*Cin, Lp)     space-to-depth input, spatial flattened (row stride Wo+1), bf16
    # w_ref:  (4, Co_blk, 4*Cin) per-tap conv weights, bf16
    # o_ref:  (B, Co_blk, Lt)    output on the lane-padded flattened grid (wrapper trims)
    B = xs_ref.shape[0]
    Co_blk = o_ref.shape[1]
    Lt = o_ref.shape[2]
    rs = row_stride

    # Per-tap weights: free leading-dim slices, loaded once per grid step.
    w0 = w_ref[0]
    w1 = w_ref[1]
    w2 = w_ref[2]
    w3 = w_ref[3]

    # Lane validity: drop the per-row padding column (r % rs == rs-1) and the trailing
    # 128-alignment pad lanes (r >= l_valid) from the InstanceNorm statistics.
    col = lax.broadcasted_iota(jnp.int32, (Co_blk, Lt), 1)
    valid = ((col % rs) < (rs - 1)) & (col < l_valid)
    inv_n = 1.0 / float(n_valid)

    def body(b, carry):
        # Four accumulating MXU matmuls (one per 2x2 tap).  Each tap is a lane-offset
        # window of the VMEM-resident block feeding the MXU directly -- no (K, L) im2col
        # buffer is ever materialized.  bf16 operands, f32 accumulation.
        y = jnp.dot(w0, xs_ref[b, :, 0:Lt], preferred_element_type=jnp.float32)
        y = y + jnp.dot(w1, xs_ref[b, :, 1:1 + Lt], preferred_element_type=jnp.float32)
        y = y + jnp.dot(w2, xs_ref[b, :, rs:rs + Lt], preferred_element_type=jnp.float32)
        y = y + jnp.dot(w3, xs_ref[b, :, rs + 1:rs + 1 + Lt],
                        preferred_element_type=jnp.float32)          # (Co_blk, Lt) f32

        # InstanceNorm2d(affine=False), f32: masked mean, then centered second moment
        # (avoids the E[y^2] - E[y]^2 cancellation), biased variance, clamped >= 0 by
        # construction.
        mean = jnp.sum(jnp.where(valid, y, 0.0), axis=-1, keepdims=True) * inv_n
        d = jnp.where(valid, y - mean, 0.0)
        var = jnp.sum(d * d, axis=-1, keepdims=True) * inv_n
        yn = (y - mean) * lax.rsqrt(var + EPS)

        # LeakyReLU(alpha); cast only on the final (lane-dense, 128-aligned) store.
        o_ref[b] = jnp.maximum(yn, alpha * yn).astype(o_ref.dtype)
        return carry

    if B == 1:
        body(0, 0)                                   # static index, no loop machinery
    else:
        lax.fori_loop(0, B, body, 0, unroll=True)    # LLO-visible unrolled loop


def conv_in_lrelu(x, weight, *, alpha=ALPHA, samples_per_block=1, co_block=None,
                  compute_dtype=jnp.bfloat16, out_dtype=jnp.bfloat16):
    """Conv2d(k=4, s=2, p=1) + InstanceNorm2d(affine=False) + LeakyReLU(alpha).

    x: (N, Cin, H, W) NCHW.  weight: (Co, Cin, 4, 4) (PyTorch OIHW).  Returns
    (N, Co, H/2, W/2) in `out_dtype` (bf16 by default; downstream conv layers consume bf16).
    `compute_dtype` is the MXU operand dtype (bf16 by default; accumulation is always f32),
    so results differ from an f32 PyTorch forward at the ~1e-2 level.
    The Conv2d bias is intentionally not taken: InstanceNorm(affine=False) cancels any
    per-channel constant, so it has no effect on the output.
    """
    N, Cin, H, W = x.shape
    Co = weight.shape[0]
    assert weight.shape == (Co, Cin, 4, 4), weight.shape
    assert H % 2 == 0 and W % 2 == 0

    Ho, Wo = H // 2, W // 2
    Hp2, Wp2 = Ho + 1, Wo + 1           # space-to-depth grid of the pad-1 input
    C4 = 4 * Cin                        # channels after folding the 2x2 parity into channels
    L = Ho * Wp2                        # valid flattened output grid (row stride Wp2 on lanes)
    Lt = _round_up(L, 128)              # lane-dense output length (unmasked 128-wide stores)
    Lp = _round_up(Lt + Wp2 + 1, 128)   # input window length incl. the last tap's reach

    B = samples_per_block
    assert N % B == 0, (N, B)
    if co_block is None:
        co_block = Co if Co <= 128 else 128
    assert Co % co_block == 0, (Co, co_block)

    # --- layout prep: cheap XLA pad/reshape/transpose, no im2col inflation ----------------
    # Cast to bf16 *first* so the whole space-to-depth shuffle and its HBM writeback run at
    # half the bytes (the op is HBM-bound at these channel counts).
    xh = x.astype(compute_dtype)
    xp = jnp.pad(xh, ((0, 0), (0, 0), (1, 1), (1, 1)))                  # (N, Cin, H+2, W+2)
    xs = xp.reshape(N, Cin, Hp2, 2, Wp2, 2)                             # row = 2*gy+py, col = 2*gx+px
    xs = xs.transpose(0, 1, 3, 5, 2, 4).reshape(N, C4, Hp2 * Wp2)       # c' = ci*4 + py*2 + px
    xs = jnp.pad(xs, ((0, 0), (0, 0), (0, Lp - Hp2 * Wp2)))             # (N, C4, Lp)

    # weight (Co, Cin, ky, kx) -> (tap = dy*2+dx, Co, ci*4 + py*2 + px): per-tap weight is a
    # free leading-dim slice in the kernel (no lane-misaligned K slicing, no concat).
    w = weight.reshape(Co, Cin, 2, 2, 2, 2).transpose(2, 4, 0, 1, 3, 5)
    w = w.reshape(4, Co, C4).astype(compute_dtype)

    # Chip-aware scoped-VMEM limit: ~96 MiB on v5e/v6e (128 MiB physical), ~48 MiB on v7x
    # (64 MiB physical).  Per-step working set at realistic sizes stays well below this.
    try:
        vmem_cap = int(pltpu.get_tpu_info().vmem_capacity_bytes)
    except Exception:  # pragma: no cover - conservative fallback
        vmem_cap = 128 * 1024 * 1024
    vmem_limit = min((vmem_cap * 3) // 4, 100 * 1024 * 1024)

    kern = functools.partial(_conv_in_lrelu_kernel, l_valid=L, row_stride=Wp2,
                             n_valid=Ho * Wo, alpha=alpha)

    out = pl.pallas_call(
        kern,
        out_shape=jax.ShapeDtypeStruct((N, Co, Lt), out_dtype),
        grid_spec=pltpu.PrefetchScalarGridSpec(
            num_scalar_prefetch=0,
            grid=(N // B, Co // co_block),
            in_specs=[
                # Same activation block across the Co axis -> the pipeline skips re-DMA.
                pl.BlockSpec((B, C4, Lp), lambda n, c: (n, 0, 0)),
                pl.BlockSpec((4, co_block, C4), lambda n, c: (0, c, 0)),
            ],
            out_specs=pl.BlockSpec((B, co_block, Lt), lambda n, c: (n, c, 0)),
        ),
        compiler_params=pltpu.CompilerParams(
            # Both axes are independent (per-sample, per-channel IN stats) -> megacore /
            # v7x dual-TC sharding even for N=1.
            dimension_semantics=("parallel", "parallel"),
            vmem_limit_bytes=vmem_limit,
        ),
    )(xs, w)

    # Drop the 128-alignment pad lanes and the per-row padding column, restore NCHW.
    return out[..., :L].reshape(N, Co, Ho, Wp2)[..., :Wo]


def ref_forward(x, weight, bias, alpha=ALPHA):
    """Pure-JAX f32 reference of the PyTorch module (bias included to show it cancels)."""
    y = lax.conv_general_dilated(
        x, weight, window_strides=(2, 2), padding=[(1, 1), (1, 1)],
        dimension_numbers=("NCHW", "OIHW", "NCHW"))
    y = y + bias.reshape(1, -1, 1, 1)
    mean = y.mean(axis=(2, 3), keepdims=True)
    var = ((y - mean) ** 2).mean(axis=(2, 3), keepdims=True)
    y = (y - mean) * lax.rsqrt(var + EPS)
    return jnp.where(y >= 0, y, alpha * y)


if __name__ == "__main__":
    N, Cin, Co, H, W = 2, 4, 8, 16, 16

    key = jax.random.PRNGKey(0)
    kx, kw, kb = jax.random.split(key, 3)
    x = jax.random.normal(kx, (N, Cin, H, W), dtype=jnp.float32)
    # Shapes match nn.Conv2d(Cin, Co, kernel_size=4, stride=2, padding=1).
    weight = jax.random.normal(kw, (Co, Cin, 4, 4), dtype=jnp.float32) * 0.1
    bias = jax.random.normal(kb, (Co,), dtype=jnp.float32) * 0.1

    ref = jax.block_until_ready(ref_forward(x, weight, bias))

    # Default path: one sample per grid step (2 parallel grid steps over the batch).
    out = jax.block_until_ready(jax.jit(conv_in_lrelu)(x, weight))
    assert out.shape == (N, Co, H // 2, W // 2), out.shape
    err = float(jnp.max(jnp.abs(out.astype(jnp.float32) - ref)))
    # bf16 MXU operands + bf16 output store vs. f32 reference on unit-variance post-IN outputs.
    assert err < 6e-2, err

    # Batched path: both samples in one grid step (amortizes per-step overhead / weight push).
    out2 = jax.block_until_ready(
        jax.jit(functools.partial(conv_in_lrelu, samples_per_block=2))(x, weight))
    err2 = float(jnp.max(jnp.abs(out2.astype(jnp.float32) - ref)))
    assert err2 < 6e-2, err2

    print("KERNEL_OK")
</pallas_src>

<mosaic_0001>
module attributes {stable_mosaic.version = 11 : i64} {
  func.func @_conv_in_lrelu_kernel(%arg0: i32, %arg1: i32, %arg2: memref<1x16x256xbf16, #tpu.memory_space<vmem>>, %arg3: memref<4x8x16xbf16, #tpu.memory_space<vmem>>, %arg4: memref<1x8x128xbf16, #tpu.memory_space<vmem>>) attributes {dimension_semantics = [#tpu.dimension_semantics<parallel>, #tpu.dimension_semantics<parallel>], iteration_bounds = array<i64: 2, 1>, scalar_prefetch = 0 : i64, scratch_operands = 0 : i64, tpu.core_type = #tpu.core_type<tc>, window_params = [{transform_indices = @transform_0, window_bounds = array<i64: 1, 16, 256>}, {transform_indices = @transform_1, window_bounds = array<i64: 4, 8, 16>}, {transform_indices = @transform_2, window_bounds = array<i64: 1, 8, 128>}]} {
    %c0 = arith.constant 0 : index
    %c0_0 = arith.constant 0 : index
    %c0_1 = arith.constant 0 : index
    %0 = vector.load %arg3[%c0, %c0_0, %c0_1] : memref<4x8x16xbf16, #tpu.memory_space<vmem>>, vector<1x8x16xbf16>
    %1 = vector.shape_cast %0 : vector<1x8x16xbf16> to vector<8x16xbf16>
    %c1 = arith.constant 1 : index
    %c0_2 = arith.constant 0 : index
    %c0_3 = arith.constant 0 : index
    %2 = vector.load %arg3[%c1, %c0_2, %c0_3] : memref<4x8x16xbf16, #tpu.memory_space<vmem>>, vector<1x8x16xbf16>
    %3 = vector.shape_cast %2 : vector<1x8x16xbf16> to vector<8x16xbf16>
    %c2 = arith.constant 2 : index
    %c0_4 = arith.constant 0 : index
    %c0_5 = arith.constant 0 : index
    %4 = vector.load %arg3[%c2, %c0_4, %c0_5] : memref<4x8x16xbf16, #tpu.memory_space<vmem>>, vector<1x8x16xbf16>
    %5 = vector.shape_cast %4 : vector<1x8x16xbf16> to vector<8x16xbf16>
    %c3 = arith.constant 3 : index
    %c0_6 = arith.constant 0 : index
    %c0_7 = arith.constant 0 : index
    %6 = vector.load %arg3[%c3, %c0_6, %c0_7] : memref<4x8x16xbf16, #tpu.memory_space<vmem>>, vector<1x8x16xbf16>
    %7 = vector.shape_cast %6 : vector<1x8x16xbf16> to vector<8x16xbf16>
    %8 = tpu.iota {dimensions = array<i32: 1>} : vector<8x128xi32>
    %c9_i32 = arith.constant 9 : i32
    %c0_i32 = arith.constant 0 : i32
    %9 = arith.cmpi eq, %c9_i32, %c0_i32 : i32
    %c1_i32 = arith.constant 1 : i32
    %10 = arith.select %9, %c1_i32, %c9_i32 : i32
    %11 = vector.broadcast %10 : i32 to vector<8x128xi32>
    %12 = arith.remsi %8, %11 : vector<8x128xi32>
    %c0_i32_8 = arith.constant 0 : i32
    %13 = vector.broadcast %c0_i32_8 : i32 to vector<8x128xi32>
    %14 = arith.cmpi ne, %12, %13 : vector<8x128xi32>
    %c0_i32_9 = arith.constant 0 : i32
    %15 = vector.broadcast %c0_i32_9 : i32 to vector<8x128xi32>
    %16 = arith.cmpi slt, %12, %15 : vector<8x128xi32>
    %c0_i32_10 = arith.constant 0 : i32
    %17 = arith.cmpi slt, %10, %c0_i32_10 : i32
    %18 = vector.broadcast %17 : i1 to vector<8x128xi1>
    %19 = vector.broadcast %18 : vector<8x128xi1> to vector<8x128xi1>
    %20 = arith.xori %16, %19 : vector<8x128xi1>
    %21 = arith.andi %20, %14 : vector<8x128xi1>
    %22 = vector.broadcast %10 : i32 to vector<8x128xi32>
    %23 = arith.addi %12, %22 : vector<8x128xi32>
    %24 = arith.select %21, %23, %12 : vector<8x128xi1>, vector<8x128xi32>
    %c8_i32 = arith.constant 8 : i32
    %25 = vector.broadcast %c8_i32 : i32 to vector<8x128xi32>
    %26 = arith.cmpi slt, %24, %25 : vector<8x128xi32>
    %c72_i32 = arith.constant 72 : i32
    %27 = vector.broadcast %c72_i32 : i32 to vector<8x128xi32>
    %28 = arith.cmpi slt, %8, %27 : vector<8x128xi32>
    %29 = arith.andi %26, %28 : vector<8x128xi1>
    %c0_11 = arith.constant 0 : index
    %c0_12 = arith.constant 0 : index
    %c0_13 = arith.constant 0 : index
    %30 = vector.load %arg2[%c0_11, %c0_12, %c0_13] : memref<1x16x256xbf16, #tpu.memory_space<vmem>>, vector<1x16x128xbf16>
    %31 = vector.shape_cast %30 : vector<1x16x128xbf16> to vector<16x128xbf16>
    %cst = arith.constant dense<0.000000e+00> : vector<8x128xf32>
    %32 = tpu.matmul %1, %31, %cst {dimension_numbers = #tpu.dot_dimension_numbers<[1], [0], [0], [1], [0, 0, 1, 1], [], []>} : vector<8x16xbf16>, vector<16x128xbf16>, vector<8x128xf32> -> vector<8x128xf32>
    %c0_14 = arith.constant 0 : index
    %c0_15 = arith.constant 0 : index
    %c1_16 = arith.constant 1 : index
    %33 = vector.load %arg2[%c0_14, %c0_15, %c1_16] : memref<1x16x256xbf16, #tpu.memory_space<vmem>>, vector<1x16x128xbf16>
    %34 = vector.shape_cast %33 : vector<1x16x128xbf16> to vector<16x128xbf16>
    %cst_17 = arith.constant dense<0.000000e+00> : vector<8x128xf32>
    %35 = tpu.matmul %3, %34, %cst_17 {dimension_numbers = #tpu.dot_dimension_numbers<[1], [0], [0], [1], [0, 0, 1, 1], [], []>} : vector<8x16xbf16>, vector<16x128xbf16>, vector<8x128xf32> -> vector<8x128xf32>
    %36 = arith.addf %32, %35 : vector<8x128xf32>
    %c0_18 = arith.constant 0 : index
    %c0_19 = arith.constant 0 : index
    %c9 = arith.constant 9 : index
    %37 = vector.load %arg2[%c0_18, %c0_19, %c9] : memref<1x16x256xbf16, #tpu.memory_space<vmem>>, vector<1x16x128xbf16>
    %38 = vector.shape_cast %37 : vector<1x16x128xbf16> to vector<16x128xbf16>
    %cst_20 = arith.constant dense<0.000000e+00> : vector<8x128xf32>
    %39 = tpu.matmul %5, %38, %cst_20 {dimension_numbers = #tpu.dot_dimension_numbers<[1], [0], [0], [1], [0, 0, 1, 1], [], []>} : vector<8x16xbf16>, vector<16x128xbf16>, vector<8x128xf32> -> vector<8x128xf32>
    %40 = arith.addf %36, %39 : vector<8x128xf32>
    %c0_21 = arith.constant 0 : index
    %c0_22 = arith.constant 0 : index
    %c10 = arith.constant 10 : index
    %41 = vector.load %arg2[%c0_21, %c0_22, %c10] : memref<1x16x256xbf16, #tpu.memory_space<vmem>>, vector<1x16x128xbf16>
    %42 = vector.shape_cast %41 : vector<1x16x128xbf16> to vector<16x128xbf16>
    %cst_23 = arith.constant dense<0.000000e+00> : vector<8x128xf32>
    %43 = tpu.matmul %7, %42, %cst_23 {dimension_numbers = #tpu.dot_dimension_numbers<[1], [0], [0], [1], [0, 0, 1, 1], [], []>} : vector<8x16xbf16>, vector<16x128xbf16>, vector<8x128xf32> -> vector<8x128xf32>
    %44 = arith.addf %40, %43 : vector<8x128xf32>
    %cst_24 = arith.constant 0.000000e+00 : f32
    %45 = vector.broadcast %cst_24 : f32 to vector<8x128xf32>
    %46 = arith.select %29, %44, %45 : vector<8x128xi1>, vector<8x128xf32>
    %cst_25 = arith.constant dense<0.000000e+00> : vector<8xf32>
    %47 = vector.multi_reduction <add>, %46, %cst_25 [1] : vector<8x128xf32> to vector<8xf32>
    %48 = vector.shape_cast %47 : vector<8xf32> to vector<8x1xf32>
    %cst_26 = arith.constant 1.562500e-02 : f32
    %49 = vector.broadcast %cst_26 : f32 to vector<8x1xf32>
    %50 = arith.mulf %48, %49 : vector<8x1xf32>
    %51 = vector.broadcast %50 : vector<8x1xf32> to vector<8x128xf32>
    %52 = arith.subf %44, %51 : vector<8x128xf32>
    %cst_27 = arith.constant 0.000000e+00 : f32
    %53 = vector.broadcast %cst_27 : f32 to vector<8x128xf32>
    %54 = arith.select %29, %52, %53 : vector<8x128xi1>, vector<8x128xf32>
    %55 = arith.mulf %54, %54 : vector<8x128xf32>
    %cst_28 = arith.constant dense<0.000000e+00> : vector<8xf32>
    %56 = vector.multi_reduction <add>, %55, %cst_28 [1] : vector<8x128xf32> to vector<8xf32>
    %57 = vector.shape_cast %56 : vector<8xf32> to vector<8x1xf32>
    %cst_29 = arith.constant 1.562500e-02 : f32
    %58 = vector.broadcast %cst_29 : f32 to vector<8x1xf32>
    %59 = arith.mulf %57, %58 : vector<8x1xf32>
    %60 = vector.broadcast %50 : vector<8x1xf32> to vector<8x128xf32>
    %61 = arith.subf %44, %60 : vector<8x128xf32>
    %cst_30 = arith.constant 9.99999974E-6 : f32
    %62 = vector.broadcast %cst_30 : f32 to vector<8x1xf32>
    %63 = arith.addf %59, %62 : vector<8x1xf32>
    %64 = math.rsqrt %63 : vector<8x1xf32>
    %65 = vector.broadcast %64 : vector<8x1xf32> to vector<8x128xf32>
    %66 = arith.mulf %61, %65 : vector<8x128xf32>
    %cst_31 = arith.constant 2.000000e-01 : f32
    %67 = vector.broadcast %cst_31 : f32 to vector<8x128xf32>
    %68 = arith.mulf %67, %66 : vector<8x128xf32>
    %69 = arith.maximumf %66, %68 : vector<8x128xf32>
    %70 = arith.truncf %69 : vector<8x128xf32> to vector<8x128xbf16>
    %c0_32 = arith.constant 0 : index
    %c0_33 = arith.constant 0 : index
    %c0_34 = arith.constant 0 : index
    %71 = vector.load %arg4[%c0_32, %c0_33, %c0_34] : memref<1x8x128xbf16, #tpu.memory_space<vmem>>, vector<1x8x128xbf16>
    %72 = vector.shape_cast %71 : vector<1x8x128xbf16> to vector<8x128xbf16>
    %73 = vector.shape_cast %70 : vector<8x128xbf16> to vector<1x8x128xbf16>
    tpu.vector_store %arg4[%c0_32, %c0_33, %c0_34], %73 {strides = array<i32>} : memref<1x8x128xbf16, #tpu.memory_space<vmem>>, vector<1x8x128xbf16>,
    return
  }
  func.func @transform_0(%arg0: i32, %arg1: i32) -> (i32, i32, i32) {
    %c0_i32 = arith.constant 0 : i32
    %c0_i32_0 = arith.constant 0 : i32
    %c0_i32_1 = arith.constant 0 : i32
    return %arg0, %c0_i32, %c0_i32_0 : i32, i32, i32
  }
  func.func @transform_1(%arg0: i32, %arg1: i32) -> (i32, i32, i32) {
    %c0_i32 = arith.constant 0 : i32
    %c0_i32_0 = arith.constant 0 : i32
    %c0_i32_1 = arith.constant 0 : i32
    return %c0_i32, %arg1, %c0_i32_0 : i32, i32, i32
  }
  func.func @transform_2(%arg0: i32, %arg1: i32) -> (i32, i32, i32) {
    %c0_i32 = arith.constant 0 : i32
    %c0_i32_0 = arith.constant 0 : i32
    return %arg0, %arg1, %c0_i32 : i32, i32, i32
  }
}

</mosaic_0001>

<bundles_post_ra>
// kernel: conv_in_lrelu.1
= control target key start
LH: loop header
LB: loop body
LE: loop exit
PB: predicated region body
PF: predicated region fallthrough
CT: control target
= control target key end

     0   :  { %7 = vsyncpa [#allocation3], 0  ;;  %s1127_s0 = inlined_call_operand.hbm [shape: bf16[2,16,256], index: 0, kind: input, shape index: {}]   ;;  %s1128_s1 = inlined_call_operand.hbm [shape: bf16[4,8,16], index: 1, kind: input, shape index: {}]   ;;  %s1129_s2 = inlined_call_operand.hbm [shape: bf16[2,8,128], index: 2, kind: output, shape index: {}]  }
   0x1   :  { %9 = vsyncpa [#allocation3 + $0x1], 0 }
   0x2   :  { %10 = vsyncpa [#allocation6], 0 }
   0x3   :  { %11 = vsyncpa [#allocation4], 0 }
   0x4   :  { %13 = vsyncpa [#allocation4 + $0x1], 0  ;;  %s892_s9 = smov 0   ;;  %s894_s10 = smov 0  }
   0x5   :  { %s896_s11 = smov 0   ;;  %s898_s12 = smov 0  }
   0x6   :  { %s900_s13 = smov 0   ;;  %s902_s14 = smov 0  }
   0x7 LB: > { %s564_s15 = sadd.s32 4294967295, %s863_s14   ;;  %s565_s16 = sadd.s32 4294967294, %s863_s14   ;;  %s863_s14 = sphi %s902_s14, %s19_s14   ;;  %s859_s13 = sphi %s900_s13, %s1153_s13   ;;  %s855_s12 = sphi %s898_s12, %s1152_s12   ;;  %s851_s11 = sphi %s896_s11, %s1151_s11   ;;  %s847_s10 = sphi %s894_s10, %s1150_s10   ;;  %s843_s9 = sphi %s892_s9, %s1149_s9  }
   0x8   : > { %p51_p0 = scmp.ne.s32.totalorder %s847_s10, %s843_s9  ;;  %p926_p1 = scmp.eq.s32.totalorder %s564_s15, 0 }
   0x9   : > { %p930_p2 = scmp.eq.s32.totalorder %s564_s15, 1  ;;  %p109_p3 = scmp.eq.s32.totalorder %s565_s16, 1 }
   0xa   : > { %s1134_s17 = scalar_select %p926_p1, 1, 0 }
   0xb   : > { %s1135_s18 = scalar_select %p930_p2, 1, 0 }
   0xc   : > { %p936_p4 = por %p926_p1, %p51_p0  ;;  %p566_p5 = scmp.ge.s32.totalorder %s863_s14, 1 }
   0xd   : > { %p941_p6 = por %p109_p3, %p51_p0  ;;  %p116_p7 = scmp.lt.s32.totalorder %s863_s14, 3 }
   0xe   : > { %s1136_s19 = scalar_select %p936_p4, 1, 0 }
   0xf   : > { %s1137_s20 = scalar_select %p941_p6, 1, 0 }
  0x10   : > { %p946_p8 = pnand %p566_p5, %p116_p7  ;;  %s865_s22 = smov [#allocation5]  }
  0x11   : > { %s130_s23 = sshll.u32 %s865_s22, 4  ;;  %s31_s25 = sadd.s32 1, %s859_s13  ;;  %s131_s23 = int_to_ptr.vmem [resolvable:$true] %s130_s23 }
  0x12   : > { %s1138_s21 = scalar_select %p946_p8, 1, 0 }
  0x13   : > { %p639_p9 = pneg %p946_p8  ;;  %s719_s28 = scalar_lea.hbm %s1128_s1, 256 }
  0x14   : > { %p720_p12 = scmp.ne.s32.totalorder %s1128_s1, %s719_s28  ;;  %p726_p5 = scmp.lt.u32.totalorder %s719_s28, %s1128_s1 }
  0x15   : > { %p955_p11 = pnand %p639_p9, %p926_p1 }
  0x17   : > { %p721_p13 = pneg %p955_p11 }
  0x19   : > { %p722_p0 = pnand %p721_p13, %p720_p12 }
  0x1b   : > { %p723_p3 = pneg %p722_p0 }
  0x1d   : > { %p728_p7 = pnand %p726_p5, %p723_p3 }
  0x1f   : > { %731 = shalt.err (!%p728_p7)
}
  0x20   : > { %s732_s5 = scalar_lea.vmem %s131_s23, 256  ;;  %p740_p1 = scmp.lt.s32.totalorder %s131_s23, %s131_s23 }
  0x21   : > { %p733_p9 = scmp.ne.s32.totalorder %s131_s23, %s732_s5  ;;  %p741_p4 = scmp.lt.s32.totalorder %s732_s5, %s732_s5 }
  0x23   : > { %p735_p10 = pnand %p733_p9, %p721_p13  ;;  %p742_p8 = por %p741_p4, %p740_p1 }
  0x25   : > { %p736_p6 = pneg %p735_p10 }
  0x27   : > { %p743_p2 = pnand %p742_p8, %p736_p6 }
  0x29   : > { %746 = shalt.err (!%p743_p2)
}
  0x2a   : > { %s866_s6 = smov 64   ;;  %s867_s7 = smov 4  }
  0x2b   : > { %642 = dma.hbm_to_vmem [thread:$0]  (!%p955_p11), %s1128_s1, 256, %s131_s23, [#allocation6], %s866_s6, %s866_s6, %s867_s7  }
  0x2c   : > { %p33_p1 = scmp.ge.s32.totalorder %s31_s25, 2  ;;  %s38_s16 = sadd.s32 1, %s851_s11 }
  0x2d   : > { %p45_p2 = scmp.ne.s32.totalorder %s851_s11, %s847_s10  ;;  %p46_p4 = scmp.eq.s32.totalorder %s863_s14, 0 }
  0x2e   : > { %s1155_s25 = smov (%p33_p1, %s31_s25), 0  ;;  %p1141_p8 = scmp.ne.s32.totalorder %s1135_s18, 0 }
  0x2f   : > { %p982_p6 = por %p46_p4, %p45_p2  ;;  %s35_s24 = ssub.s32 %s859_s13, %s1155_s25 }
  0x30   : > { %p988_p10 = por %p1141_p8, %p45_p2  ;;  %p652_p12 = scmp.lt.s32.totalorder %s863_s14, 2 }
  0x31   : > { %p36_p11 = scmp.eq.s32.totalorder %s35_s24, 0  ;;  %s144_s23 = sand.u32 1, %s851_s11  }
  0x32   : > { %s569_s27 = sshll.u32 %s144_s23, 4  ;;  %s587_s29 = sshll.u32 %s859_s13, 8 }
  0x33   : > { %s997_s28 = scalar_select %p36_p11, %s851_s11, %s38_s16  }
  0x34   : > { %s1003_s4 = scalar_lea.hbm %s1127_s0, %s587_s29  ;;  %s148_s18 = scalar_lea.vmem [#allocation2], %s569_s27 }
  0x35   : > { %s155_s5 = sshll.u32 %s148_s18, 4  ;;  %p1009_p13 = pnand %p652_p12, %p982_p6  ;;  %s1005_s5 = int_to_ptr.vmem [resolvable:$true] %s155_s5 }
  0x36   : > { %s1013_s7 = scalar_lea.sflag [#allocation3], %s144_s23  ;;  %s747_s8 = scalar_lea.hbm %s1003_s4, 256 }
  0x37   : > { %p748_p0 = scmp.ne.s32.totalorder %s1003_s4, %s747_s8  ;;  %p749_p3 = pneg %p1009_p13 }
  0x38   : > { %s752_s22 = scalar_lea.hbm %s1127_s0, 512  ;;  %p753_p9 = scmp.lt.u32.totalorder %s1003_s4, %s1127_s0 }
  0x39   : > { %p750_p5 = pnand %p749_p3, %p748_p0  ;;  %p754_p1 = scmp.lt.u32.totalorder %s752_s22, %s747_s8 }
  0x3a   : > { %p756_p4 = scmp.lt.u32.totalorder %s747_s8, %s1003_s4 }
  0x3b   : > { %p751_p7 = pneg %p750_p5  ;;  %p755_p2 = por %p754_p1, %p753_p9 }
  0x3d   : > { %p757_p6 = por %p756_p4, %p755_p2 }
  0x3f   : > { %p758_p8 = pnand %p757_p6, %p751_p7 }
  0x41   : > { %761 = shalt.err (!%p758_p8)
}
  0x42   : > { %s762_s23 = scalar_lea.vmem %s1005_s5, 256  ;;  %s868_s29 = smov [#allocation2]  }
  0x43   : > { %p763_p12 = scmp.ne.s32.totalorder %s1005_s5, %s762_s23  ;;  %s767_s30 = sshll.u32 %s868_s29, 4  ;;  %s768_s30 = int_to_ptr.vmem [resolvable:$false] %s767_s30 }
  0x44   : > { %s769_s3 = scalar_lea.vmem %s768_s30, 512  ;;  %p770_p5 = scmp.lt.s32.totalorder %s1005_s5, %s768_s30 }
  0x45   : > { %p765_p11 = pnand %p763_p12, %p749_p3  ;;  %p771_p9 = scmp.lt.s32.totalorder %s769_s3, %s762_s23 }
  0x47   : > { %p766_p0 = pneg %p765_p11  ;;  %p772_p1 = por %p771_p9, %p770_p5 }
  0x49   : > { %p773_p2 = pnand %p772_p1, %p766_p0 }
  0x4b   : > { %776 = shalt.err (!%p773_p2)
}
  0x4c   : > { %s869_s18 = smov 128   ;;  %s870_s8 = smov 8  }
  0x4d   : > { %646 = dma.hbm_to_vmem [thread:$0]  (!%p1009_p13), %s1003_s4, 256, %s1005_s5, %s1013_s7, %s869_s18, %s869_s18, %s870_s8  }
  0x4e   : > { %p1144_p3 = scmp.ne.s32.totalorder %s1138_s21, 0 }
  0x4f   : > { %s1044_s15 = sand.u32 (!%p1144_p3), 1, %s847_s10   ;;  %p1145_p7 = scmp.ne.s32.totalorder (!%p1144_p3), %s1136_s19, 0 }
  0x50   : > { %167 = sbr.rel (%p1144_p3) target bundleno = 772 (0x304), region = 28  ;;  %s573_s16 = sshll.u32 (!%p1144_p3), %s1044_s15, 4 }
  0x51   : > { %s170_s22 = scalar_lea.sflag (!%p1144_p3), [#allocation3], %s1044_s15  ;;  %s1048_s24 = scalar_lea.vmem (!%p1144_p3), [#allocation2], %s573_s16 }
  0x57   : > { %830 = dma.done.wait (%p1145_p7), %s170_s22, 256  }
  0x58   : > { %832 = vsyncadd (%p1145_p7), %s170_s22, 4294967040  ;;  %p1146_p13 = scmp.ne.s32.totalorder %s1134_s17, 0 }
  0x5a   : > { %834 = dma.done.wait (%p1146_p13), [#allocation6], 256  }
  0x5b   : > { %836 = vsyncadd (%p1146_p13), [#allocation6], 4294967040  ;;  %v871_v0 = vmov 0.0   ;;  %vm872_vm0 = vmmov 0   ;;  %v713_v1 = vld [vmem:[%s1048_s24] ss:$8 sps:$4 sm:$0xff]   ;;  %v206_v17 = vlaneseq }
  0x5c   : > { %596 = vmatprep.subr.bf16.mxu1 %v871_v0  ;;  %608 = vmatprep.subr.bf16.mxu0 %v871_v0  ;;  %v715_v2 = vld [vmem:[%s1048_s24 + $0x4] ss:$8 sps:$4 sm:$0xff]   ;;  %s873_s19 = smov 119   ;;  %s874_s21 = smov 127   ;;  %vm243_vm1 = vcmask 1039360   ;;  %vm343_vm2 = vcmask 973824  }
  0x5d   : > { %598 = vmatprep.mubr.msk.bf16.mxu1 %vm872_vm0, %v871_v0  ;;  %610 = vmatprep.mubr.msk.bf16.mxu0 %vm872_vm0, %v871_v0  ;;  %s875_s17 = smov 118   ;;  %vm394_vm3 = vcmask 965632   ;;  %vm246_vm4 = vcmask 130048   ;;  %v201_v9 = vld [vmem:[#allocation5 + $0x4] sm:$0xf]  ;;  %v207_v18 = vand.u32 127, %v206_v17 }
  0x5e   : > { %339 = vrot.lane.b32.xlu1 %v713_v1, %s873_s19  ;;  %239 = vrot.lane.b32.xlu0 %v713_v1, %s874_s21  ;;  %v203_v10 = vld [vmem:[#allocation5 + $0x8] sm:$0xf]  ;;  %v199_v15 = vld [vmem:[#allocation5] sm:$0xf]  ;;  %v205_v16 = vld [vmem:[#allocation5 + $0xc] sm:$0xf] }
  0x5f   : > { %v716_v11 = vld [vmem:[%s1048_s24] ss:$8 sps:$4 sm:$0xff]   ;;  %v1069_v19 = vmul.u32.u64.low 3817748708, %v207_v18  ;;  %v1070_v20 = vmul.u32.u64.high 3817748708, %v207_v18, %v1069_v19  ;;  %vm225_vm9 = vcmp.lt.s32.totalorder %v207_v18, 72  ;;  %s575_s4 = sshll.u32 %s1044_s15, 2 }
  0x60   : > { %s584_s5 = sshll.u32 %s855_s12, 6  ;;  %s197_s6 = scalar_lea.vmem [#allocation7], %s575_s4 }
  0x61   : > { %v214_v21 = vshrl.u32 %v1070_v20, 3  ;;  %s473_s7 = sshll.u32 %s197_s6, 4  ;;  %s1078_s29 = scalar_lea.hbm %s1129_s2, %s584_s5  ;;  %s1080_s7 = int_to_ptr.vmem [resolvable:$true] %s473_s7 }
  0x62   : > { %341 = vrot.lane.b32.xlu1 %v715_v2, %s873_s19  ;;  %241 = vrot.lane.b32.xlu0 %v715_v2, %s874_s21  ;;  %s459_s30 = scalar_lea.sflag [#allocation4], %s1044_s15  ;;  %s777_s3 = scalar_lea.vmem %s1080_s7, 64 }
  0x63   : > { %v215_v22 = vmul.u32 9, %v214_v21  ;;  %p778_p4 = scmp.ne.s32.totalorder %s1080_s7, %s777_s3  ;;  %s876_s12 = smov [#allocation7]  }
  0x64   : > { %s781_s18 = sshll.u32 %s876_s12, 4  ;;  %s782_s18 = int_to_ptr.vmem [resolvable:$false] %s781_s18 }
  0x65   : > { %v216_v23 = vsub.s32 %v207_v18, %v215_v22  ;;  %p779_p6 = pnand %p778_p4, %p988_p10  ;;  %s783_s8 = scalar_lea.vmem %s782_s18, 128 }
  0x66   : > { %392 = vrot.lane.b32.xlu1 %v715_v2, %s875_s17  ;;  %390 = vrot.lane.b32.xlu0 %v713_v1, %s875_s17  ;;  %p784_p12 = scmp.lt.s32.totalorder %s1080_s7, %s782_s18  ;;  %p785_p11 = scmp.lt.s32.totalorder %s783_s8, %s777_s3 }
  0x67   : > { %vm219_vm5 = vcmp.ne.s32.totalorder %v216_v23, 0  ;;  %vm220_vm6 = vcmp.lt.s32.totalorder %v216_v23, 0  ;;  %v222_v24 = vadd.s32 9, %v216_v23  ;;  %p780_p8 = pneg %p779_p6 }
  0x68   : > { %vm221_vm7 = vmand %vm220_vm6, %vm219_vm5  ;;  %p786_p0 = por %p785_p11, %p784_p12 }
  0x69   : > { %v223_v25 = vsel %vm221_vm7, %v222_v24, %v216_v23 }
  0x6a   : > { %vm224_vm8 = vcmp.lt.s32.totalorder %v223_v25, 8  ;;  %p787_p5 = pnand %p786_p0, %p780_p8 }
  0x6b   : > { %vm226_vm10 = vmand %vm224_vm8, %vm225_vm9 }
  0xd0   : > { %v340_v3 = vpop.permute.xlu1 %339  ;;  %v240_v4 = vpop.permute.xlu0 %239 }
  0xd4   : > { %v342_v5 = vpop.permute.xlu1 %341  ;;  %v242_v6 = vpop.permute.xlu0 %241 }
  0xd5   : > { %v244_v7 = vsel %vm243_vm1, %v240_v4, %v242_v6  ;;  %v344_v8 = vsel %vm343_vm2, %v340_v3, %v342_v5 }
  0xd6   : > { %597 = vmatpush3.bf16.msra.mxu1 %v244_v7  ;;  %609 = vmatpush3.bf16.msra.mxu0 %v344_v8 }
  0xd7   : > { %602 = vmatprep.subr.bf16.mxu1 %v871_v0  ;;  %614 = vmatprep.subr.bf16.mxu0 %v871_v0 }
  0xd8   : > { %v393_v12 = vpop.permute.xlu1 %392  ;;  %v391_v13 = vpop.permute.xlu0 %390 }
  0xd9   : > { %v395_v14 = vsel %vm394_vm3, %v391_v13, %v393_v12  ;;  %599 = vmatmul.mubr.msk.bf16.vlgmr.msra.gmra.mrb[0].mxu1 %vm246_vm4, %v201_v9  ;;  %611 = vmatmul.mubr.msk.bf16.vlgmr.msra.gmra.mrb[0].mxu0 %vm246_vm4, %v203_v10 }
  0xda   : > { %603 = vmatpush3.bf16.msra.mxu1 %v716_v11  ;;  %615 = vmatpush3.bf16.msra.mxu0 %v395_v14 }
  0xdb   : > { %604 = vmatprep.mubr.msk.bf16.mxu1 %vm872_vm0, %v871_v0  ;;  %616 = vmatprep.mubr.msk.bf16.mxu0 %vm872_vm0, %v871_v0 }
  0xe5   : > { %605 = vmatmul.mubr.msk.bf16.vlgmr.msra.gmra.mrb[0].mxu1 %vm246_vm4, %v199_v15  ;;  %617 = vmatmul.mubr.msk.bf16.vlgmr.msra.gmra.mrb[0].mxu0 %vm246_vm4, %v205_v16 }
 0x1b8   : > { %v333_v26 = vpop.f32.mrb[0].mxu1  ;;  %v434_v27 = vpop.f32.mrb[0].mxu0 }
 0x1b9   : > { %v620_v28 = vadd.f32 %v434_v27, %v333_v26  ;;  %v606_v29 = vpop.f32.mrb[1].mxu1  ;;  %v618_v30 = vpop.f32.mrb[1].mxu0 }
 0x1ba   : > { %v336_v31 = vpop.f32.mrb[2].mxu1  ;;  %v437_v32 = vpop.f32.mrb[2].mxu0 }
 0x1bb   : > { %v607_v33 = vpop.f32.mrb[3].mxu1  ;;  %v619_v34 = vpop.f32.mrb[3].mxu0  ;;  %v441_v35 = vsel %vm226_vm10, %v620_v28, 0.0 }
 0x1bc   : > { %442 = vadd.xlane.f32.xlu0 %v441_v35 }
 0x249   : > { %v443_v36 = vpop.xlane.xlu0 %442 }
 0x24a   : > { %v444_v37 = vmul.f32 0.015625, %v443_v36 }
 0x24c   : > { %v445_v38 = vsub.f32 %v620_v28, %v444_v37 }
 0x24e   : > { %v446_v39 = vsel %vm226_vm10, %v445_v38, 0.0 }
 0x24f   : > { %v447_v40 = vmul.f32 %v446_v39, %v446_v39 }
 0x251   : > { %448 = vadd.xlane.f32.xlu1 %v447_v40 }
 0x2de   : > { %v449_v41 = vpop.xlane.xlu1 %448 }
 0x2df   : > { %v450_v42 = vmul.f32 0.015625, %v449_v41 }
 0x2e1   : > { %v451_v43 = vadd.f32 1e-05, %v450_v42 }
 0x2e3   : > { %717 = vrsqrt.f32 %v451_v43 }
 0x2ed   : > { %v718_v44 = vpop.eup %717 }
 0x2ee   : > { %v453_v45 = vmul.f32 %v718_v44, %v445_v38 }
 0x2f0   : > { %v454_v46 = vmul.f32 0.2, %v453_v45 }
 0x2f2   : > { %v455_v47 = vmax.f32 %v453_v45, %v454_v46 }
 0x2f4   : > { %v456_v48 = vpack.c.bf16 %v455_v47, %v455_v47 }
 0x2f6   : > { %457 = vst [vmem:[%s197_s6] sm:$0xf] %v456_v48 }
 0x2f7   : > { %790 = shalt.err (!%p787_p5)
}
 0x2f8   : > { %s791_s15 = scalar_lea.hbm %s1078_s29, 64  ;;  %s795_s24 = scalar_lea.hbm %s1129_s2, 128 }
 0x2f9   : > { %p792_p9 = scmp.ne.s32.totalorder %s1078_s29, %s791_s15  ;;  %p796_p3 = scmp.lt.u32.totalorder %s1078_s29, %s1129_s2 }
 0x2fa   : > { %p797_p7 = scmp.lt.u32.totalorder %s795_s24, %s791_s15  ;;  %p799_p4 = scmp.lt.u32.totalorder %s791_s15, %s1078_s29 }
 0x2fb   : > { %p793_p1 = pnand %p792_p9, %p988_p10 }
 0x2fc   : > { %p798_p13 = por %p797_p7, %p796_p3 }
 0x2fd   : > { %p794_p2 = pneg %p793_p1 }
 0x2fe   : > { %p800_p6 = por %p799_p4, %p798_p13 }
 0x300   : > { %p801_p8 = pnand %p800_p6, %p794_p2 }
 0x302   : > { %804 = shalt.err (!%p801_p8)
}
 0x303   : > { %637 = dma.vmem_to_hbm [thread:$0]  (%p988_p10), %s1080_s7, 64, %s1078_s29, %s459_s30  }
 0x304 PF: > { %s485_s17 = sand.u32 1, %s843_s9   ;;  %p1147_p12 = scmp.ne.s32.totalorder %s1137_s20, 0 }
 0x305   : > { %p1148_p11 = scmp.ge.s32.totalorder %s863_s14, 2  ;;  %s486_s4 = scalar_lea.sflag [#allocation4], %s485_s17 }
 0x307   : > { %p648_p0 = pnand %p1148_p11, %p1147_p12 }
 0x309   : > { %838 = dma.done.wait (!%p648_p0), %s486_s4, 64  }
 0x30a   : > { %840 = vsyncadd (!%p648_p0), %s486_s4, 4294967232  ;;  %s19_s14 = sadd.s32 1, %s863_s14   ;;  %s1149_s9 = smov %s847_s10 }
 0x30b   : > { %p16_p5 = scmp.ge.s32.totalorder %s19_s14, 4   ;;  %s1150_s10 = smov %s851_s11 }
 0x30c   : > { %s1151_s11 = smov %s997_s28  ;;  %s1152_s12 = smov %s859_s13 }
 0x30d   : > { %s1153_s13 = smov %s1155_s25  ;;  %18 = sbr.rel (!%p16_p5) target bundleno = 7 (0x7), region = 81 }
 0x314   :  { %491 = vsyncpa [#allocation3], 1 }
 0x315   :  { %493 = vsyncpa [#allocation3 + $0x1], 1 }
 0x316   :  { %494 = vsyncpa [#allocation6], 1 }
 0x317   :  { %495 = vsyncpa [#allocation4], 1 }
 0x318   :  { %497 = vsyncpa [#allocation4 + $0x1], 1 }

</bundles_post_ra>
